<compile_context>
chip_gen: v7x
topology: tpu7x:2x2x1
jax: 0.10.0
libtpu: 0.0.40
codegen_flags: <defaults>
</compile_context>

<pallas_src>
import functools

import jax
import jax.numpy as jnp
from jax.experimental import pallas as pl
from jax.experimental.pallas import tpu as pltpu


# --------------------------------------------------------------------------- #
# Kernels
# --------------------------------------------------------------------------- #
def _qkv_projection_kernel(x_ref, w_ref, b_ref, q_ref, k_ref, v_ref, *,
                           hidden_dim, matmul_dtype):
    """Grid step = (batch b, token tile i); channel-major layout.

    x_ref : (C, T)  f32   input tokens for this tile
    w_ref : (3C, C) md    fused [scale*Wq; Wk; Wv]   (resident)
    b_ref : (3C, 1) f32   fused [scale*bq; bk; bv]   (resident)
    q/k/v : (C, T)  md    projected outputs
    """
    C = hidden_dim
    x = x_ref[...].astype(matmul_dtype)                               # (C, T)
    qkv = jnp.dot(w_ref[...], x, preferred_element_type=jnp.float32)
    qkv = qkv + b_ref[...]                                            # (3C, T) f32
    q_ref[...] = qkv[:C, :].astype(q_ref.dtype)
    k_ref[...] = qkv[C:2 * C, :].astype(k_ref.dtype)
    v_ref[...] = qkv[2 * C:, :].astype(v_ref.dtype)


def _attention_kernel(x_ref, q_ref, k_ref, v_ref, wo_ref, bo_ref, o_ref, att_sc,
                      *, num_heads, head_dim, kv_len, unroll_heads, approx_recip,
                      matmul_dtype):
    """Grid step = (batch b, query tile i); channel-major layout.

    x_ref  : (C, T)  f32   residual input tile (per-step block)
    q_ref  : (C, T)  md    pre-projected, pre-scaled queries for this tile
    k_ref  : (C, Sp) md    keys   (per-batch resident, Sp = padded token count)
    v_ref  : (C, Sp) md    values (per-batch resident)
    wo_ref : (C, C)  md    output 1x1 conv weight (resident)
    bo_ref : (C, 1)  f32   output 1x1 conv bias   (resident)
    o_ref  : (C, T)  f32   x + output_conv(attended)
    att_sc : (C, T)  f32   VMEM scratch collecting every head's attended values
    """
    D = head_dim
    s_pad = k_ref.shape[-1]

    # Additive key mask for padded token columns (only materialised if padded).
    if kv_len < s_pad:
        col = jax.lax.broadcasted_iota(jnp.int32, (1, s_pad), 1)
        key_bias = jnp.where(col < kv_len, 0.0, -1e30).astype(jnp.float32)
    else:
        key_bias = None

    def one_head(lo):
        q_h = q_ref[pl.ds(lo, D), :]                                  # (D, T)
        k_h = k_ref[pl.ds(lo, D), :]                                  # (D, Sp)
        v_h = v_ref[pl.ds(lo, D), :]                                  # (D, Sp)
        # scores[i, j] = sum_d q[d, i] * k[d, j]   (scale folded into q)
        s = jax.lax.dot_general(q_h, k_h, (((0,), (0,)), ((), ())),
                                preferred_element_type=jnp.float32)   # (T, Sp)
        if key_bias is not None:
            s = s + key_bias
        m = jnp.max(s, axis=-1, keepdims=True)
        p = jnp.exp(s - m)
        l = jnp.sum(p, axis=-1, keepdims=True)
        p = p * pl.reciprocal(l, approx=approx_recip)
        # attended[d, i] = sum_j v[d, j] * softmax(s)[i, j]
        att = jax.lax.dot_general(v_h, p.astype(matmul_dtype),
                                  (((1,), (1,)), ((), ())),
                                  preferred_element_type=jnp.float32)  # (D, T)
        att_sc[pl.ds(lo, D), :] = att

    if unroll_heads:
        # tiny head_dim (< 8 sublanes): static slices, fully unrolled
        for h in range(num_heads):
            one_head(h * D)
    else:
        # bounded live ranges: one (T, Sp) score tile live at a time
        @pl.loop(0, num_heads)
        def _(h):
            one_head(pl.multiple_of(h * D, D))

    # Single full-width output 1x1 conv over all heads (MXU K = C), + bias
    # + residual, written as a lane-dense (C, T) tile.
    attended = att_sc[...].astype(matmul_dtype)
    proj = jnp.dot(wo_ref[...], attended, preferred_element_type=jnp.float32)
    o_ref[...] = (x_ref[...] + proj + bo_ref[...]).astype(o_ref.dtype)


# --------------------------------------------------------------------------- #
# Wrapper
# --------------------------------------------------------------------------- #
def _pick_token_tile(num_tokens, requested):
    """Token tile for the query/output axis (the lane dimension of the blocks)."""
    if requested is None:
        tile = num_tokens if num_tokens <= 512 else 256
    else:
        tile = max(int(requested), 8)
    if tile >= num_tokens:
        return num_tokens                       # single tile spans the whole axis
    if tile % 128 != 0:
        tile = ((tile + 127) // 128) * 128      # lane-aligned query tiles
    return min(tile, num_tokens)


def spatial_attention(x_nchw, params, num_heads, *, matmul_dtype=jnp.bfloat16,
                      q_tile=None):
    """Pallas TPU forward of SpatialAttention.  x_nchw: (B, C, H, W) float32."""
    B, C, H, W = x_nchw.shape
    assert C % num_heads == 0, "hidden_dim must be divisible by num_heads"
    D = C // num_heads
    S = H * W
    scale = float(D) ** -0.5
    md = jnp.dtype(matmul_dtype)
    md_bytes = md.itemsize
    approx_recip = md != jnp.dtype(jnp.float32)

    wq, bq, wk, bk, wv, bv, wo, bo = params

    # Fused QKV weight/bias; the attention scale is folded into the query rows.
    w_qkv = jnp.concatenate([wq * scale, wk, wv], axis=0).astype(md)       # (3C, C)
    b_qkv = jnp.concatenate([bq * scale, bk, bv], axis=0)
    b_qkv = b_qkv.reshape(3 * C, 1).astype(jnp.float32)
    wo_c = wo.astype(md)                                                    # (C, C)
    bo_c = bo.reshape(C, 1).astype(jnp.float32)

    # Channel-major tokens: a free reshape of NCHW (no transposes anywhere).
    x_cs = x_nchw.reshape(B, C, S).astype(jnp.float32)

    tile = _pick_token_tile(S, q_tile)
    n_t = pl.cdiv(S, tile)
    s_pad = n_t * tile
    if s_pad != S:
        # Pad the token axis; padded key columns are masked inside the kernel,
        # padded query rows are sliced off below.
        x_cs = jnp.pad(x_cs, ((0, 0), (0, 0), (0, s_pad - S)))

    unroll_heads = (D % 8 != 0) or (num_heads <= 2)
    live_heads = num_heads if unroll_heads else 1

    # VMEM budget: resident weights + pipelined blocks + per-head intermediates.
    f32b = 4
    est = 4 * C * C * md_bytes + 4 * C * f32b                     # weights/biases
    est += 2 * 2 * C * tile * f32b + 2 * C * tile * md_bytes      # x, out, q blocks
    est += 2 * 2 * C * s_pad * md_bytes                           # resident K, V
    est += C * tile * f32b                                        # attended scratch
    est += live_heads * tile * s_pad * (f32b + md_bytes)          # scores / probs
    est += 3 * C * tile * (f32b + md_bytes)                       # projection temps
    vmem_limit = int(min(64 * 2 ** 20, max(32 * 2 ** 20, 1.25 * est)))

    def resident(shape):
        return pl.BlockSpec(shape, lambda b, i: (0,) * len(shape))

    tok_block = pl.BlockSpec((None, C, tile), lambda b, i: (b, 0, i))
    batch_block = pl.BlockSpec((None, C, s_pad), lambda b, i: (b, 0, 0))
    cparams = pltpu.CompilerParams(
        dimension_semantics=("parallel", "parallel"),
        vmem_limit_bytes=vmem_limit)

    # ---- 1) fused QKV projection: (3C, C) x (C, tile) per token tile ---------
    q_cs, k_cs, v_cs = pl.pallas_call(
        functools.partial(_qkv_projection_kernel, hidden_dim=C, matmul_dtype=md),
        out_shape=[jax.ShapeDtypeStruct((B, C, s_pad), md)] * 3,
        grid_spec=pltpu.PrefetchScalarGridSpec(
            num_scalar_prefetch=0,
            grid=(B, n_t),
            in_specs=[tok_block, resident((3 * C, C)), resident((3 * C, 1))],
            out_specs=[tok_block, tok_block, tok_block],
        ),
        compiler_params=cparams,
    )(x_cs, w_qkv, b_qkv)

    # ---- 2) attention + output 1x1 conv + residual over (batch, q tile) ------
    out_cs = pl.pallas_call(
        functools.partial(_attention_kernel, num_heads=num_heads, head_dim=D,
                          kv_len=S, unroll_heads=unroll_heads,
                          approx_recip=approx_recip, matmul_dtype=md),
        out_shape=jax.ShapeDtypeStruct((B, C, s_pad), jnp.float32),
        grid_spec=pltpu.PrefetchScalarGridSpec(
            num_scalar_prefetch=0,
            grid=(B, n_t),
            in_specs=[
                tok_block,                      # x (residual), per-step block
                tok_block,                      # q, per-step block
                batch_block,                    # k, per-batch resident
                batch_block,                    # v, per-batch resident
                resident((C, C)),               # output conv weight
                resident((C, 1)),               # output conv bias
            ],
            out_specs=tok_block,
            scratch_shapes=[pltpu.VMEM((C, tile), jnp.float32)],
        ),
        compiler_params=cparams,
    )(x_cs, q_cs, k_cs, v_cs, wo_c, bo_c)

    if s_pad != S:
        out_cs = out_cs[:, :, :S]
    return out_cs.reshape(B, C, H, W)


# --------------------------------------------------------------------------- #
# Pure-JAX reference (matches the PyTorch forward exactly, f32)
# --------------------------------------------------------------------------- #
def spatial_attention_reference(x, params, num_heads):
    B, C, H, W = x.shape
    D = C // num_heads
    S = H * W
    wq, bq, wk, bk, wv, bv, wo, bo = params
    xf = x.reshape(B, C, S)
    hp = jax.lax.Precision.HIGHEST

    def conv1x1(w, b):
        return jnp.einsum('oc,bcs->bos', w, xf, precision=hp) + b[None, :, None]

    q = conv1x1(wq, bq).reshape(B, num_heads, D, S)
    k = conv1x1(wk, bk).reshape(B, num_heads, D, S)
    v = conv1x1(wv, bv).reshape(B, num_heads, D, S)
    scores = jnp.einsum('bhdi,bhdj->bhij', q, k, precision=hp) * (float(D) ** -0.5)
    attn = jax.nn.softmax(scores, axis=-1)
    attended = jnp.einsum('bhdj,bhij->bhdi', v, attn, precision=hp)
    attended = attended.reshape(B, C, S)
    out = jnp.einsum('oc,bcs->bos', wo, attended, precision=hp) + bo[None, :, None]
    return x + out.reshape(B, C, H, W)


def init_params(key, hidden_dim):
    ks = jax.random.split(key, 8)
    std = 0.1
    mk = lambda i, shape: std * jax.random.normal(ks[i], shape, jnp.float32)
    return (mk(0, (hidden_dim, hidden_dim)), mk(1, (hidden_dim,)),
            mk(2, (hidden_dim, hidden_dim)), mk(3, (hidden_dim,)),
            mk(4, (hidden_dim, hidden_dim)), mk(5, (hidden_dim,)),
            mk(6, (hidden_dim, hidden_dim)), mk(7, (hidden_dim,)))


if __name__ == "__main__":
    root = jax.random.PRNGKey(0)

    def check(batch, hidden_dim, num_heads, height, width, *, q_tile=None,
              matmul_dtype=jnp.bfloat16, atol=5e-2, rtol=5e-2):
        kk = jax.random.fold_in(root, hidden_dim * height * width + batch)
        k_x, k_p = jax.random.split(kk)
        x = jax.random.normal(k_x, (batch, hidden_dim, height, width), jnp.float32)
        params = init_params(k_p, hidden_dim)
        ref = spatial_attention_reference(x, params, num_heads)
        out = jax.block_until_ready(
            spatial_attention(x, params, num_heads, matmul_dtype=matmul_dtype,
                              q_tile=q_tile))
        assert out.shape == x.shape
        err = float(jnp.max(jnp.abs(out - ref)))
        assert jnp.allclose(out, ref, atol=atol, rtol=rtol), \
            f"max abs err {err} (matmul_dtype={matmul_dtype})"

    # Config 1: module-default 8 heads, tiny 8x8 map -> single query tile,
    # head_dim=4 -> unrolled head loop.  bf16 MXU path + tight f32-operand path
    # (exact reciprocal on the f32 path).
    check(2, 32, 8, 8, 8)
    check(2, 32, 8, 8, 8, matmul_dtype=jnp.float32, atol=5e-3, rtol=5e-3)

    # Config 2: head_dim=16 -> pl.loop head path; S=160 with 128-wide query
    # tiles -> multi-tile query axis, padded + masked key columns, resident K/V.
    check(1, 128, 8, 8, 20, q_tile=128)

    print("KERNEL_OK")
</pallas_src>

<mosaic_0001>
module attributes {stable_mosaic.version = 11 : i64} {
  func.func @_qkv_projection_kernel(%arg0: i32, %arg1: i32, %arg2: memref<1x32x64xf32, #tpu.memory_space<vmem>>, %arg3: memref<96x32xbf16, #tpu.memory_space<vmem>>, %arg4: memref<96x1xf32, #tpu.memory_space<vmem>>, %arg5: memref<1x32x64xbf16, #tpu.memory_space<vmem>>, %arg6: memref<1x32x64xbf16, #tpu.memory_space<vmem>>, %arg7: memref<1x32x64xbf16, #tpu.memory_space<vmem>>) attributes {dimension_semantics = [#tpu.dimension_semantics<parallel>, #tpu.dimension_semantics<parallel>], iteration_bounds = array<i64: 2, 1>, scalar_prefetch = 0 : i64, scratch_operands = 0 : i64, tpu.core_type = #tpu.core_type<tc>, window_params = [{transform_indices = @transform_0, window_bounds = array<i64: 1, 32, 64>}, {pipeline_mode = #tpu.pipeline_mode<synchronous>, transform_indices = @transform_1, window_bounds = array<i64: 96, 32>}, {pipeline_mode = #tpu.pipeline_mode<synchronous>, transform_indices = @transform_2, window_bounds = array<i64: 96, 1>}, {transform_indices = @transform_3, window_bounds = array<i64: 1, 32, 64>}, {transform_indices = @transform_4, window_bounds = array<i64: 1, 32, 64>}, {transform_indices = @transform_5, window_bounds = array<i64: 1, 32, 64>}]} {
    %c0 = arith.constant 0 : index
    %c0_0 = arith.constant 0 : index
    %c0_1 = arith.constant 0 : index
    %0 = vector.load %arg2[%c0, %c0_0, %c0_1] : memref<1x32x64xf32, #tpu.memory_space<vmem>>, vector<1x32x64xf32>
    %1 = vector.shape_cast %0 : vector<1x32x64xf32> to vector<32x64xf32>
    %2 = arith.truncf %1 : vector<32x64xf32> to vector<32x64xbf16>
    %c0_2 = arith.constant 0 : index
    %c0_3 = arith.constant 0 : index
    %3 = vector.load %arg3[%c0_2, %c0_3] : memref<96x32xbf16, #tpu.memory_space<vmem>>, vector<96x32xbf16>
    %cst = arith.constant dense<0.000000e+00> : vector<96x64xf32>
    %4 = tpu.matmul %3, %2, %cst {dimension_numbers = #tpu.dot_dimension_numbers<[1], [0], [0], [1], [0, 0, 1, 1], [], []>} : vector<96x32xbf16>, vector<32x64xbf16>, vector<96x64xf32> -> vector<96x64xf32>
    %c0_4 = arith.constant 0 : index
    %c0_5 = arith.constant 0 : index
    %5 = vector.load %arg4[%c0_4, %c0_5] : memref<96x1xf32, #tpu.memory_space<vmem>>, vector<96x1xf32>
    %6 = vector.broadcast %5 : vector<96x1xf32> to vector<96x64xf32>
    %7 = arith.addf %4, %6 : vector<96x64xf32>
    %8 = vector.extract_strided_slice %7 {offsets = [0, 0], sizes = [32, 64], strides = [1, 1]} : vector<96x64xf32> to vector<32x64xf32>
    %9 = arith.truncf %8 : vector<32x64xf32> to vector<32x64xbf16>
    %c0_6 = arith.constant 0 : index
    %c0_7 = arith.constant 0 : index
    %c0_8 = arith.constant 0 : index
    %10 = vector.load %arg5[%c0_6, %c0_7, %c0_8] : memref<1x32x64xbf16, #tpu.memory_space<vmem>>, vector<1x32x64xbf16>
    %11 = vector.shape_cast %10 : vector<1x32x64xbf16> to vector<32x64xbf16>
    %12 = vector.shape_cast %9 : vector<32x64xbf16> to vector<1x32x64xbf16>
    tpu.vector_store %arg5[%c0_6, %c0_7, %c0_8], %12 {strides = array<i32>} : memref<1x32x64xbf16, #tpu.memory_space<vmem>>, vector<1x32x64xbf16>,
    %13 = vector.extract_strided_slice %7 {offsets = [32, 0], sizes = [32, 64], strides = [1, 1]} : vector<96x64xf32> to vector<32x64xf32>
    %14 = arith.truncf %13 : vector<32x64xf32> to vector<32x64xbf16>
    %c0_9 = arith.constant 0 : index
    %c0_10 = arith.constant 0 : index
    %c0_11 = arith.constant 0 : index
    %15 = vector.load %arg6[%c0_9, %c0_10, %c0_11] : memref<1x32x64xbf16, #tpu.memory_space<vmem>>, vector<1x32x64xbf16>
    %16 = vector.shape_cast %15 : vector<1x32x64xbf16> to vector<32x64xbf16>
    %17 = vector.shape_cast %14 : vector<32x64xbf16> to vector<1x32x64xbf16>
    tpu.vector_store %arg6[%c0_9, %c0_10, %c0_11], %17 {strides = array<i32>} : memref<1x32x64xbf16, #tpu.memory_space<vmem>>, vector<1x32x64xbf16>,
    %18 = vector.extract_strided_slice %7 {offsets = [64, 0], sizes = [32, 64], strides = [1, 1]} : vector<96x64xf32> to vector<32x64xf32>
    %19 = arith.truncf %18 : vector<32x64xf32> to vector<32x64xbf16>
    %c0_12 = arith.constant 0 : index
    %c0_13 = arith.constant 0 : index
    %c0_14 = arith.constant 0 : index
    %20 = vector.load %arg7[%c0_12, %c0_13, %c0_14] : memref<1x32x64xbf16, #tpu.memory_space<vmem>>, vector<1x32x64xbf16>
    %21 = vector.shape_cast %20 : vector<1x32x64xbf16> to vector<32x64xbf16>
    %22 = vector.shape_cast %19 : vector<32x64xbf16> to vector<1x32x64xbf16>
    tpu.vector_store %arg7[%c0_12, %c0_13, %c0_14], %22 {strides = array<i32>} : memref<1x32x64xbf16, #tpu.memory_space<vmem>>, vector<1x32x64xbf16>,
    return
  }
  func.func @transform_0(%arg0: i32, %arg1: i32) -> (i32, i32, i32) {
    %c0_i32 = arith.constant 0 : i32
    %c0_i32_0 = arith.constant 0 : i32
    return %arg0, %c0_i32, %arg1 : i32, i32, i32
  }
  func.func @transform_1(%arg0: i32, %arg1: i32) -> (i32, i32) {
    %c0_i32 = arith.constant 0 : i32
    %c0_i32_0 = arith.constant 0 : i32
    %c0_i32_1 = arith.constant 0 : i32
    return %c0_i32, %c0_i32_0 : i32, i32
  }
  func.func @transform_2(%arg0: i32, %arg1: i32) -> (i32, i32) {
    %c0_i32 = arith.constant 0 : i32
    %c0_i32_0 = arith.constant 0 : i32
    %c0_i32_1 = arith.constant 0 : i32
    return %c0_i32, %c0_i32_0 : i32, i32
  }
  func.func @transform_3(%arg0: i32, %arg1: i32) -> (i32, i32, i32) {
    %c0_i32 = arith.constant 0 : i32
    %c0_i32_0 = arith.constant 0 : i32
    return %arg0, %c0_i32, %arg1 : i32, i32, i32
  }
  func.func @transform_4(%arg0: i32, %arg1: i32) -> (i32, i32, i32) {
    %c0_i32 = arith.constant 0 : i32
    %c0_i32_0 = arith.constant 0 : i32
    return %arg0, %c0_i32, %arg1 : i32, i32, i32
  }
  func.func @transform_5(%arg0: i32, %arg1: i32) -> (i32, i32, i32) {
    %c0_i32 = arith.constant 0 : i32
    %c0_i32_0 = arith.constant 0 : i32
    return %arg0, %c0_i32, %arg1 : i32, i32, i32
  }
}

</mosaic_0001>

<bundles_post_ra>
// kernel: tpu_custom_call.1
= control target key start
LH: loop header
LB: loop body
LE: loop exit
PB: predicated region body
PF: predicated region fallthrough
CT: control target
= control target key end

     0   :  { %11 = vsyncpa [#allocation3], 0  ;;  %s1393_s0 = inlined_call_operand.vmem [shape: f32[2,32,64], index: 0, kind: input, shape index: {}]   ;;  %s1394_s1 = inlined_call_operand.vmem [shape: bf16[96,32], index: 1, kind: input, shape index: {}]   ;;  %s1395_s2 = inlined_call_operand.vmem [shape: f32[96,1], index: 2, kind: input, shape index: {}]   ;;  %s1396_s3 = inlined_call_operand.hbm [shape: bf16[2,32,64], index: 3, kind: output, shape index: {0}]   ;;  %s1397_s4 = inlined_call_operand.hbm [shape: bf16[2,32,64], index: 4, kind: output, shape index: {1}]   ;;  %s1398_s5 = inlined_call_operand.hbm [shape: bf16[2,32,64], index: 5, kind: output, shape index: {2}]  }
   0x1   :  { %13 = vsyncpa [#allocation3 + $0x1], 0 }
   0x2   :  { %14 = vsyncpa [#allocation5], 0 }
   0x3   :  { %16 = vsyncpa [#allocation5 + $0x1], 0  ;;  %s1095_s18 = smov 0   ;;  %s1097_s19 = smov 0  }
   0x4   :  { %s1099_s20 = smov 0   ;;  %s1101_s21 = smov 0  }
   0x5   :  { %s1103_s22 = smov 0   ;;  %s1105_s23 = smov 0  }
   0x6 LB: > { %s754_s24 = sadd.s32 4294967295, %s1057_s23   ;;  %s1399_s25 = sadd.s32 4294967294, %s1057_s23   ;;  %s1057_s23 = sphi %s1105_s23, %s22_s23   ;;  %s1053_s22 = sphi %s1103_s22, %s1411_s22   ;;  %s1049_s21 = sphi %s1101_s21, %s1410_s21   ;;  %s1045_s20 = sphi %s1099_s20, %s1409_s20   ;;  %s1041_s19 = sphi %s1097_s19, %s1408_s19   ;;  %s1037_s18 = sphi %s1095_s18, %s1407_s18  }
   0x7   : > { %s34_s26 = sadd.s32 1, %s1053_s22  ;;  %s113_s27 = sadd.s32 1, %s1045_s20 }
   0x8   : > { %p36_p0 = scmp.ge.s32.totalorder %s34_s26, 2  ;;  %p123_p1 = scmp.ne.s32.totalorder %s1045_s20, %s1041_s19 }
   0x9   : > { %p124_p2 = scmp.eq.s32.totalorder %s754_s24, 1  ;;  %p129_p3 = scmp.ne.s32.totalorder %s1041_s19, %s1037_s18 }
   0xa   : > { %s1413_s26 = smov (%p36_p0, %s34_s26), 0  ;;  %p130_p5 = scmp.eq.s32.totalorder %s1399_s25, 1 }
   0xb   : > { %p1137_p4 = por %p124_p2, %p123_p1  ;;  %s108_s29 = ssub.s32 %s1053_s22, %s1413_s26 }
   0xc   : > { %p758_p6 = scmp.ge.s32.totalorder %s1057_s23, 1  ;;  %p111_p7 = scmp.eq.s32.totalorder %s108_s29, 0 }
   0xd   : > { %p1146_p8 = por %p130_p5, %p129_p3  ;;  %p221_p9 = scmp.lt.s32.totalorder %s1057_s23, 3 }
   0xe   : > { %s1152_s6 = scalar_select %p111_p7, %s1045_s20, %s113_s27  }
   0xf   : > { %p222_p10 = pnand %p758_p6, %p221_p9 }
  0x10   : > { %p262_p11 = scmp.lt.s32.totalorder (!%p222_p10), %s1049_s21, 1  ;;  %v913_v0 = vld [vmem:[%s1394_s1] sm:$0xff] (!%p222_p10)   ;;  %vm391_vm0 = vcmask (!%p222_p10), 261120   ;;  %v914_v1 = vld [vmem:[%s1394_s1 + $0x10] sm:$0xff] (!%p222_p10)   ;;  %v1059_v2 = vmov (!%p222_p10), 0   ;;  %v296_v11 = vld [vmem:[%s1395_s2 + $0x38] sm:$0xff] (!%p222_p10) }
  0x11   : > { %225 = sbr.rel (%p222_p10) target bundleno = 323 (0x143), region = 32  ;;  %827 = vmatprep.mubr.msk.bf16.mxu0 (!%p222_p10), %vm391_vm0, %v913_v0  ;;  %831 = vmatprep.mubr.msk.bf16.mxu1 (!%p222_p10), %vm391_vm0, %v914_v1  ;;  %v295_v8 = vld [vmem:[%s1395_s2 + $0x30] sm:$0xff] (!%p222_p10)  ;;  %v293_v9 = vld [vmem:[%s1395_s2 + $0x20] sm:$0xff] (!%p222_p10)  ;;  %v294_v12 = vld [vmem:[%s1395_s2 + $0x28] sm:$0xff] (!%p222_p10)  ;;  %s1400_s9 = sand.u32 (!%p222_p10), 1, %s1041_s19   ;;  %vm507_vm1 = vcmask (!%p222_p10), 519168  }
  0x12   : > { %912 = vset.pattern.permute.xlu1 (!%p222_p10), %v1059_v2  ;;  %911 = vset.pattern.permute.xlu0 (!%p222_p10), %v1059_v2  ;;  %v915_v13 = vld [vmem:[%s1394_s1 + $0x8] sm:$0xff] (!%p222_p10)   ;;  %v916_v14 = vld [vmem:[%s1394_s1 + $0x18] sm:$0xff] (!%p222_p10)   ;;  %v289_v16 = vld [vmem:[%s1395_s2] sm:$0xff] (!%p222_p10)  ;;  %s1222_s10 = sshll.u32 (!%p222_p10), %s1400_s9, 4  ;;  %s1232_s13 = sand.u32 (!%p222_p10), 1, %s754_s24  }
  0x13   : > { %333 = vperm.xlu1 (!%p222_p10), %912, %v295_v8   ;;  %323 = vperm.xlu0 (!%p222_p10), %911, %v293_v9   ;;  %v290_v15 = vld [vmem:[%s1395_s2 + $0x8] sm:$0xff] (!%p222_p10)  ;;  %v917_v17 = vld [vmem:[%s1394_s1 + $0x20] sm:$0xff] (!%p222_p10)   ;;  %v292_v18 = vld [vmem:[%s1395_s2 + $0x18] sm:$0xff] (!%p222_p10)  ;;  %s1235_s14 = sshll.u32 (!%p222_p10), %s1049_s21, 8  ;;  %s1401_s8 = scalar_lea.sflag (!%p222_p10), [#allocation5], %s1232_s13 }
  0x14   : > { %v291_v19 = vld [vmem:[%s1395_s2 + $0x10] sm:$0xff] (!%p222_p10)  ;;  %v918_v20 = vld [vmem:[%s1394_s1 + $0x28] sm:$0xff] (!%p222_p10)   ;;  %v297_v22 = vld [vmem:[%s1395_s2 + $0x40] sm:$0xff] (!%p222_p10)  ;;  %s1252_s17 = scalar_lea.hbm (!%p222_p10), %s1397_s4, %s1235_s14  ;;  %s1263_s7 = scalar_lea.hbm (!%p222_p10), %s1396_s3, %s1235_s14 }
  0x15   : > { %v298_v21 = vld [vmem:[%s1395_s2 + $0x48] sm:$0xff] (!%p222_p10)  ;;  %v300_v23 = vld [vmem:[%s1395_s2 + $0x58] sm:$0xff] (!%p222_p10)  ;;  %v299_v24 = vld [vmem:[%s1395_s2 + $0x50] sm:$0xff] (!%p222_p10)  ;;  %s1060_s24 = smov (!%p222_p10), [#allocation4]  }
  0x16   : > { %s923_s27 = sshll.u32 (!%p222_p10), %s1060_s24, 4  ;;  %s924_s27 = int_to_ptr.vmem [resolvable:$false] %s923_s27 }
  0x17   : > { %338 = vperm.xlu1 (!%p222_p10), %912, %v296_v11   ;;  %328 = vperm.xlu0 (!%p222_p10), %911, %v294_v12   ;;  %s925_s29 = scalar_lea.vmem (!%p222_p10), %s924_s27, 512 }
  0x18   : > { %s263_s11 = scalar_select %p262_p11, %s1049_s21, 1 }
  0x1a   : > { %s799_s12 = sshll.u32 %s263_s11, 5  ;;  %s1227_s11 = scalar_lea.vmem [#allocation4], %s1222_s10 }
  0x1b   : > { %s269_s15 = scalar_lea.vmem %s1393_s0, %s799_s12  ;;  %308 = vperm.xlu1 %912, %v290_v15   ;;  %303 = vperm.xlu0 %911, %v289_v16   ;;  %s594_s12 = sshll.u32 %s1227_s11, 4  ;;  %s1240_s12 = int_to_ptr.vmem [resolvable:$true] %s594_s12 }
  0x1c   : > { %v271_v3 = vld [vmem:[%s269_s15] sm:$0xff]  ;;  %v272_v4 = vld [vmem:[%s269_s15 + $0x8] sm:$0xff]  ;;  %v273_v5 = vld [vmem:[%s269_s15 + $0x10] sm:$0xff]  ;;  %s919_s21 = scalar_lea.vmem %s1240_s12, 256  ;;  %p926_p1 = scmp.lt.s32.totalorder %s1240_s12, %s924_s27 }
  0x1d   : > { %v275_v6 = vpack.c.bf16 %v272_v4, %v271_v3  ;;  %v274_v7 = vld [vmem:[%s269_s15 + $0x18] sm:$0xff]  ;;  %s247_s15 = scalar_lea.vmem [#allocation2], %s1222_s10  ;;  %p920_p12 = scmp.ne.s32.totalorder %s1240_s12, %s919_s21 }
  0x1e   : > { %v276_v10 = vpack.c.bf16 %v274_v7, %v273_v5  ;;  %s577_s16 = sshll.u32 %s247_s15, 4  ;;  %p927_p2 = scmp.lt.s32.totalorder %s925_s29, %s919_s21  ;;  %s1254_s16 = int_to_ptr.vmem [resolvable:$true] %s577_s16 }
  0x1f   : > { %823 = vmatprep.subr.bf16.mxu0 %v275_v6  ;;  %839 = vmatprep.subr.bf16.mxu1 %v275_v6  ;;  %p921_p13 = pnand %p920_p12, %p1137_p4 }
  0x20   : > { %824 = vmatpush3.bf16.msra.mxu0 %v275_v6  ;;  %841 = vmatpush3.bf16.msra.mxu1 %v275_v6  ;;  %p928_p3 = por %p927_p2, %p926_p1 }
  0x21   : > { %825 = vmatprep.subr.bf16.mxu0 %v276_v10  ;;  %840 = vmatprep.subr.bf16.mxu1 %v276_v10  ;;  %p922_p0 = pneg %p921_p13 }
  0x22   : > { %318 = vperm.xlu1 %912, %v292_v18   ;;  %313 = vperm.xlu0 %911, %v291_v19  }
  0x23   : > { %p929_p5 = pnand %p928_p3, %p922_p0 }
  0x24   : > { %826 = vmatpush3.bf16.msra.mxu0 %v276_v10  ;;  %842 = vmatpush3.bf16.msra.mxu1 %v276_v10 }
  0x26   : > { %348 = vperm.xlu1 %912, %v298_v21   ;;  %343 = vperm.xlu0 %911, %v297_v22  }
  0x27   : > { %828 = vmatmul.mubr.msk.bf16.vlgmr.msra.gmra.mrb[0].mxu0 %vm391_vm0, %v915_v13  ;;  %832 = vmatmul.mubr.msk.bf16.vlgmr.msra.gmra.mrb[0].mxu1 %vm391_vm0, %v916_v14 }
  0x28   : > { %835 = vmatprep.mubr.msk.bf16.mxu1 %vm391_vm0, %v917_v17 }
  0x2a   : > { %358 = vperm.xlu1 %912, %v300_v23   ;;  %353 = vperm.xlu0 %911, %v299_v24  }
  0x2f   : > { %836 = vmatmul.mubr.msk.bf16.gmra.mrb[4].mxu1 %vm391_vm0, %v918_v20 }
  0x92   : > { %v324_v25 = vpop.permute.xlu0 %323  ;;  %v334_v26 = vpop.permute.xlu1 %333 }
  0x96   : > { %v329_v27 = vpop.permute.xlu0 %328  ;;  %v339_v28 = vpop.permute.xlu1 %338 }
  0x9a   : > { %v304_v29 = vpop.permute.xlu0 %303  ;;  %v309_v30 = vpop.permute.xlu1 %308 }
  0xa1   : > { %v314_v31 = vpop.permute.xlu0 %313  ;;  %v319_v32 = vpop.permute.xlu1 %318 }
  0xa5   : > { %v1224_v33 = vpop.permute.xlu0 %343  ;;  %v1237_v50 = vpop.permute.xlu1 %348 }
  0xa9   : > { %v354_v59 = vpop.permute.xlu0 %353 }
  0xfa   : > { %v829_v34 = vpop.f32.mrb[0].mxu0  ;;  %v833_v35 = vpop.f32.mrb[0].mxu1 }
  0xfb   : > { %v453_v36 = vadd.f32 %v829_v34, %v314_v31  ;;  %v469_v37 = vadd.f32 %v833_v35, %v334_v26  ;;  %v444_v38 = vpop.f32.mrb[1].mxu0  ;;  %v460_v39 = vpop.f32.mrb[1].mxu1 }
  0xfc   : > { %v445_v40 = vadd.f32 %v444_v38, %v304_v29  ;;  %v461_v41 = vadd.f32 %v460_v39, %v324_v25  ;;  %v830_v42 = vpop.f32.mrb[2].mxu0  ;;  %v834_v43 = vpop.f32.mrb[2].mxu1 }
  0xfd   : > { %v802_v44 = vpack.c.bf16 %v453_v36, %v453_v36  ;;  %v806_v45 = vpack.c.bf16 %v469_v37, %v469_v37  ;;  %v456_v46 = vadd.f32 %v830_v42, %v319_v32  ;;  %v472_v47 = vadd.f32 %v834_v43, %v339_v28  ;;  %v447_v48 = vpop.f32.mrb[3].mxu0  ;;  %v463_v49 = vpop.f32.mrb[3].mxu1 }
  0xfe   : > { %v800_v51 = vpack.c.bf16 %v445_v40, %v445_v40  ;;  %v804_v52 = vpack.c.bf16 %v461_v41, %v461_v41  ;;  %v448_v53 = vadd.f32 %v447_v48, %v309_v30  ;;  %v464_v54 = vadd.f32 %v463_v49, %v329_v27 }
  0xff   : > { %510 = vst.msk [vmem:[%s247_s15 + $0x8] sm:$0xf] %vm507_vm1, %v802_v44  ;;  %530 = vst.msk [vmem:[%s1227_s11 + $0x8] sm:$0xf] %vm507_vm1, %v806_v45  ;;  %v803_v55 = vpack.c.bf16 %v456_v46, %v456_v46  ;;  %v807_v56 = vpack.c.bf16 %v472_v47, %v472_v47 }
 0x100   : > { %508 = vst.msk [vmem:[%s247_s15] sm:$0xf] %vm507_vm1, %v800_v51  ;;  %528 = vst.msk [vmem:[%s1227_s11] sm:$0xf] %vm507_vm1, %v804_v52  ;;  %v801_v57 = vpack.c.bf16 %v448_v53, %v448_v53  ;;  %v805_v58 = vpack.c.bf16 %v464_v54, %v464_v54 }
 0x101   : > { %511 = vst.msk [vmem:[%s247_s15 + $0xc] sm:$0xf] %vm507_vm1, %v803_v55  ;;  %531 = vst.msk [vmem:[%s1227_s11 + $0xc] sm:$0xf] %vm507_vm1, %v807_v56 }
 0x102   : > { %509 = vst.msk [vmem:[%s247_s15 + $0x4] sm:$0xf] %vm507_vm1, %v801_v57  ;;  %529 = vst.msk [vmem:[%s1227_s11 + $0x4] sm:$0xf] %vm507_vm1, %v805_v58  ;;  %v837_v60 = vpop.f32.mrb[4].mxu1 }
 0x103   : > { %v1268_v61 = vadd.f32 %v837_v60, %v354_v59  ;;  %v476_v62 = vpop.f32.mrb[5].mxu1 }
 0x104   : > { %932 = shalt.err (!%p929_p5)
}
 0x105   : > { %s933_s11 = scalar_lea.hbm %s1252_s17, 256  ;;  %s937_s24 = scalar_lea.hbm %s1397_s4, 512 }
 0x106   : > { %p934_p6 = scmp.ne.s32.totalorder %s1252_s17, %s933_s11  ;;  %p938_p10 = scmp.lt.u32.totalorder %s1252_s17, %s1397_s4 }
 0x107   : > { %p939_p11 = scmp.lt.u32.totalorder %s937_s24, %s933_s11  ;;  %p941_p13 = scmp.lt.u32.totalorder %s933_s11, %s1252_s17 }
 0x108   : > { %p935_p7 = pnand %p934_p6, %p1137_p4 }
 0x109   : > { %p940_p12 = por %p939_p11, %p938_p10 }
 0x10a   : > { %p936_p9 = pneg %p935_p7 }
 0x10b   : > { %p942_p0 = por %p941_p13, %p940_p12 }
 0x10d   : > { %p943_p1 = pnand %p942_p0, %p936_p9 }
 0x10f   : > { %946 = shalt.err (!%p943_p1)
}
 0x110   : > { %s1061_s21 = smov 64   ;;  %s1062_s25 = smov 4   ;;  %v359_v63 = vpop.permute.xlu1 %358  ;;  %v477_v0 = vadd.f32 %v476_v62, %v1224_v33  ;;  %v838_v1 = vpop.f32.mrb[6].mxu1 }
 0x111   : > { %844 = dma.vmem_to_hbm [thread:$0]  (%p1137_p4), %s1240_s12, 256, %s1252_s17, %s1401_s8, %s1061_s21, %s1061_s21, %s1062_s25  }
 0x112   : > { %s1404_s9 = sand.u32 1, %s1041_s19   ;;  %s947_s11 = scalar_lea.vmem %s1254_s16, 256 }
 0x113   : > { %s1300_s29 = scalar_lea.sflag [#allocation3], %s1404_s9  ;;  %p948_p2 = scmp.ne.s32.totalorder %s1254_s16, %s947_s11 }
 0x114   : > { %s1063_s15 = smov [#allocation2]  }
 0x115   : > { %p949_p3 = pnand %p948_p2, %p1137_p4  ;;  %s951_s24 = sshll.u32 %s1063_s15, 4  ;;  %s952_s24 = int_to_ptr.vmem [resolvable:$false] %s951_s24 }
 0x116   : > { %s953_s27 = scalar_lea.vmem %s952_s24, 512  ;;  %p954_p6 = scmp.lt.s32.totalorder %s1254_s16, %s952_s24 }
 0x117   : > { %p950_p5 = pneg %p949_p3  ;;  %p955_p7 = scmp.lt.s32.totalorder %s953_s27, %s947_s11 }
 0x119   : > { %p956_p9 = por %p955_p7, %p954_p6 }
 0x11b   : > { %p957_p10 = pnand %p956_p9, %p950_p5 }
 0x11d   : > { %960 = shalt.err (!%p957_p10)
}
 0x11e   : > { %s961_s12 = scalar_lea.hbm %s1263_s7, 256  ;;  %s965_s15 = scalar_lea.hbm %s1396_s3, 512 }
 0x11f   : > { %p962_p11 = scmp.ne.s32.totalorder %s1263_s7, %s961_s12  ;;  %p966_p0 = scmp.lt.u32.totalorder %s1263_s7, %s1396_s3 }
 0x120   : > { %p967_p1 = scmp.lt.u32.totalorder %s965_s15, %s961_s12  ;;  %p969_p3 = scmp.lt.u32.totalorder %s961_s12, %s1263_s7 }
 0x121   : > { %p963_p12 = pnand %p962_p11, %p1137_p4 }
 0x122   : > { %p968_p2 = por %p967_p1, %p966_p0 }
 0x123   : > { %p964_p13 = pneg %p963_p12 }
 0x124   : > { %p970_p5 = por %p969_p3, %p968_p2 }
 0x126   : > { %p971_p6 = pnand %p970_p5, %p964_p13 }
 0x128   : > { %974 = shalt.err (!%p971_p6)
}
 0x129   : > { %843 = dma.vmem_to_hbm [thread:$0]  (%p1137_p4), %s1254_s16, 256, %s1263_s7, %s1300_s29, %s1061_s21, %s1061_s21, %s1062_s25   ;;  %v810_v2 = vpack.c.bf16 %v1268_v61, %v1268_v61  ;;  %v488_v3 = vadd.f32 %v838_v1, %v359_v63  ;;  %v479_v4 = vpop.f32.mrb[7].mxu1  ;;  %v808_v5 = vpack.c.bf16 %v477_v0, %v477_v0 }
 0x12a   : > { %s261_s8 = scalar_lea.vmem [#allocation6], %s1222_s10  ;;  %v480_v6 = vadd.f32 %v479_v4, %v1237_v50  ;;  %s1339_s7 = scalar_lea.hbm %s1398_s5, %s1235_s14 }
 0x12b   : > { %s611_s11 = sshll.u32 %s261_s8, 4  ;;  %550 = vst.msk [vmem:[%s261_s8 + $0x8] sm:$0xf] %vm507_vm1, %v810_v2  ;;  %v811_v7 = vpack.c.bf16 %v488_v3, %v488_v3  ;;  %548 = vst.msk [vmem:[%s261_s8] sm:$0xf] %vm507_vm1, %v808_v5  ;;  %s1064_s27 = smov [#allocation6]   ;;  %s1332_s11 = int_to_ptr.vmem [resolvable:$true] %s611_s11 }
 0x12c   : > { %v809_v8 = vpack.c.bf16 %v480_v6, %v480_v6  ;;  %s975_s29 = scalar_lea.vmem %s1332_s11, 256  ;;  %s979_s12 = sshll.u32 %s1064_s27, 4  ;;  %s980_s12 = int_to_ptr.vmem [resolvable:$false] %s979_s12 }
 0x12d   : > { %551 = vst.msk [vmem:[%s261_s8 + $0xc] sm:$0xf] %vm507_vm1, %v811_v7  ;;  %p976_p7 = scmp.ne.s32.totalorder %s1332_s11, %s975_s29  ;;  %s981_s17 = scalar_lea.vmem %s980_s12, 512 }
 0x12e   : > { %549 = vst.msk [vmem:[%s261_s8 + $0x4] sm:$0xf] %vm507_vm1, %v809_v8  ;;  %p982_p11 = scmp.lt.s32.totalorder %s1332_s11, %s980_s12  ;;  %p983_p12 = scmp.lt.s32.totalorder %s981_s17, %s975_s29 }
 0x12f   : > { %p977_p9 = pnand %p976_p7, %p1137_p4 }
 0x130   : > { %p984_p13 = por %p983_p12, %p982_p11 }
 0x131   : > { %p978_p10 = pneg %p977_p9 }
 0x133   : > { %p985_p0 = pnand %p984_p13, %p978_p10 }
 0x135   : > { %988 = shalt.err (!%p985_p0)
}
 0x136   : > { %s989_s14 = scalar_lea.hbm %s1339_s7, 256  ;;  %s993_s24 = scalar_lea.hbm %s1398_s5, 512 }
 0x137   : > { %p990_p1 = scmp.ne.s32.totalorder %s1339_s7, %s989_s14  ;;  %p994_p5 = scmp.lt.u32.totalorder %s1339_s7, %s1398_s5 }
 0x138   : > { %p995_p6 = scmp.lt.u32.totalorder %s993_s24, %s989_s14  ;;  %p997_p9 = scmp.lt.u32.totalorder %s989_s14, %s1339_s7 }
 0x139   : > { %p991_p2 = pnand %p990_p1, %p1137_p4 }
 0x13a   : > { %p996_p7 = por %p995_p6, %p994_p5 }
 0x13b   : > { %p992_p3 = pneg %p991_p2 }
 0x13c   : > { %p998_p10 = por %p997_p9, %p996_p7 }
 0x13e   : > { %p999_p11 = pnand %p998_p10, %p992_p3 }
 0x140   : > { %1002 = shalt.err (!%p999_p11)
}
 0x141   : > { %s1405_s10 = scalar_lea.sflag [#allocation5], %s1232_s13 }
 0x142   : > { %845 = dma.vmem_to_hbm [thread:$0]  (%p1137_p4), %s1332_s11, 256, %s1339_s7, %s1405_s10, %s1061_s21, %s1061_s21, %s1062_s25  }
 0x143 PF: > { %p859_p12 = scmp.ge.s32.totalorder %s1057_s23, 2  ;;  %s626_s29 = sand.u32 1, %s1037_s18  }
 0x144   : > { %s627_s27 = scalar_lea.sflag [#allocation3], %s626_s29 }
 0x145   : > { %p850_p13 = pnand %p859_p12, %p1146_p8 }
 0x147   : > { %1028 = dma.done.wait (!%p850_p13), %s627_s27, 256  }
 0x148   : > { %1030 = vsyncadd (!%p850_p13), %s627_s27, 4294967040  ;;  %s1406_s28 = sadd.s32 4294967294, %s1057_s23  }
 0x149   : > { %s635_s12 = sand.u32 1, %s1406_s28  }
 0x14a   : > { %s636_s17 = scalar_lea.sflag [#allocation5], %s635_s12 }
 0x14b   : > { %1032 = dma.done.wait (!%p850_p13), %s636_s17, 512  }
 0x14c   : > { %1034 = vsyncadd (!%p850_p13), %s636_s17, 4294966784  ;;  %s22_s23 = sadd.s32 1, %s1057_s23   ;;  %s1407_s18 = smov %s1041_s19 }
 0x14d   : > { %p19_p4 = scmp.ge.s32.totalorder %s22_s23, 4   ;;  %s1408_s19 = smov %s1045_s20 }
 0x14e   : > { %s1409_s20 = smov %s1152_s6  ;;  %s1410_s21 = smov %s1053_s22 }
 0x14f   : > { %s1411_s22 = smov %s1413_s26  ;;  %21 = sbr.rel (!%p19_p4) target bundleno = 6 (0x6), region = 99 }
 0x156   :  { %650 = vsyncpa [#allocation3], 1 }
 0x157   :  { %652 = vsyncpa [#allocation3 + $0x1], 1 }
 0x158   :  { %653 = vsyncpa [#allocation5], 1 }
 0x159   :  { %655 = vsyncpa [#allocation5 + $0x1], 1 }

</bundles_post_ra>
